<compile_context>
chip_gen: v6e
topology: v6e:2x2x1
jax: 0.10.0
libtpu: 0.0.40
codegen_flags: <defaults>
</compile_context>

<pallas_src>
import jax
import jax.numpy as jnp
from jax import lax
from jax.experimental import pallas as pl
from jax.experimental.pallas import tpu as pltpu

# ---------------- shapes (small, consistent with the module) ----------------
C_LAT = 4          # latent channels (z and c_concat)
H = W_SP = 16      # spatial
HW = H * W_SP      # 256 -> lane dim (lane-dense output)
C_IN = 2 * C_LAT   # z concatenated with c_concat along channels
SEQ = 8            # text sequence length
HID = 32           # text embedding width


def _cfg_denoise_kernel(z_ref, cc_ref, p_ref, scal_ref, out_ref):
    """Single invocation (no grid); all three CFG branches fused.

    z_ref   : (C_LAT, HW)       VMEM  latent z (changes every denoising step)
    cc_ref  : (C_LAT, 2*HW)     VMEM  lane-packed image conditioning:
                                      [:, :HW] = cond c_concat   (cond & img-cond branches)
                                      [:, HW:] = uncond c_concat (uncond branch)
    p_ref   : (C_LAT, C_IN+2)   VMEM  packed params: [W_z | W_cc | shift_c | shift_u]
                                      where shift_* = b + Wc @ mean(ctx_*)   (precomputed)
    scal_ref: (3,)              SMEM  [c_out = rsqrt(sigma^2+1), text_cfg, image_cfg]
    out_ref : (C_LAT, HW)       VMEM  CFG-combined output (lane-dense, 256 lanes)
    """
    c_out = scal_ref[0]
    t = scal_ref[1]
    i = scal_ref[2]

    w_z = p_ref[:, 0:C_LAT]                         # (C_LAT, C_LAT) acts on z channels
    w_cc = p_ref[:, C_LAT:C_IN]                     # (C_LAT, C_LAT) acts on c_concat channels
    shift_c = p_ref[:, C_IN:C_IN + 1]               # (C_LAT, 1): b + ctx shift (cond)
    shift_u = p_ref[:, C_IN + 1:C_IN + 2]           # (C_LAT, 1): b + ctx shift (uncond)

    # latent mix computed once and shared — z is identical across the 3 CFG branches
    hz = jnp.dot(w_z, z_ref[...], preferred_element_type=jnp.float32)     # (C_LAT, HW)
    # both distinct image-conditioning mixes in one lane-packed MXU push
    hcc = jnp.dot(w_cc, cc_ref[...], preferred_element_type=jnp.float32)  # (C_LAT, 2*HW)

    h_c = (hz + hcc[:, 0:HW]) * c_out               # cond & img-cond branches (same input)
    h_u = (hz + hcc[:, HW:2 * HW]) * c_out          # uncond branch

    # per-branch synthetic inner-model outputs (same arithmetic order as a 3-branch run)
    out_cond = h_c + shift_c
    out_img_cond = h_c + shift_u
    out_uncond = h_u + shift_u

    # exact CFG combination, same op order as the PyTorch module
    out_ref[...] = (out_uncond
                    + t * (out_cond - out_img_cond)
                    + i * (out_img_cond - out_uncond))


def prepare_cfg_conditioning(cond, uncond, text_cfg_scale, image_cfg_scale, params):
    """Loop-invariant prep: run ONCE per sampling run (not per denoising step)."""
    w, b, wc = params
    w = w.astype(jnp.float32)                                   # (C_LAT, C_IN) = [W_z | W_cc]
    b = b.astype(jnp.float32).reshape(C_LAT)
    wc = wc.astype(jnp.float32)

    # cross-attn path is independent of z / sigma: pool + project once, fold in the bias
    f_c = wc @ jnp.mean(cond['c_crossattn'][0][0].astype(jnp.float32), axis=0)    # (C_LAT,)
    f_u = wc @ jnp.mean(uncond['c_crossattn'][0][0].astype(jnp.float32), axis=0)  # (C_LAT,)
    shifts = jnp.stack([b + f_c, b + f_u], axis=1)                                # (C_LAT, 2)

    w_packed = jnp.concatenate([w, shifts], axis=1)                               # (C_LAT, C_IN+2)

    cc_packed = jnp.concatenate(
        [cond['c_concat'][0].reshape(C_LAT, HW),
         uncond['c_concat'][0].reshape(C_LAT, HW)],
        axis=1).astype(jnp.float32)                                               # (C_LAT, 2*HW)

    cfg_scales = jnp.asarray([text_cfg_scale, image_cfg_scale], jnp.float32)      # (2,)
    return w_packed, cc_packed, cfg_scales


def cfg_denoiser_step(z, sigma, prepped):
    """Per-step call — only z and sigma change between diffusion steps."""
    w_packed, cc_packed, cfg_scales = prepped
    z_flat = z.reshape(C_LAT, HW).astype(jnp.float32)

    sigma_s = jnp.asarray(sigma, jnp.float32).reshape(-1)[0]
    c_out = lax.rsqrt(sigma_s * sigma_s + 1.0)             # inner-model preconditioning scalar
    scal = jnp.concatenate([c_out[None], cfg_scales])      # (3,) -> SMEM

    out = pl.pallas_call(
        _cfg_denoise_kernel,
        out_shape=jax.ShapeDtypeStruct((C_LAT, HW), jnp.float32),
        in_specs=[
            pl.BlockSpec(memory_space=pltpu.MemorySpace.VMEM),   # z
            pl.BlockSpec(memory_space=pltpu.MemorySpace.VMEM),   # packed c_concat (cond|uncond)
            pl.BlockSpec(memory_space=pltpu.MemorySpace.VMEM),   # packed params [W|shifts]
            pl.BlockSpec(memory_space=pltpu.MemorySpace.SMEM),   # [c_out, t_cfg, i_cfg]
        ],
        out_specs=pl.BlockSpec(memory_space=pltpu.MemorySpace.VMEM),
    )(z_flat, cc_packed, w_packed, scal)

    return out.reshape(1, C_LAT, H, W_SP)                        # NCHW, batch 1


def cfg_denoiser(z, sigma, cond, uncond, text_cfg_scale, image_cfg_scale, params):
    """One-call convenience matching CFGDenoiser.forward (prep + single step)."""
    prepped = prepare_cfg_conditioning(cond, uncond, text_cfg_scale, image_cfg_scale, params)
    return cfg_denoiser_step(z, sigma, prepped)


def _reference(z, sigma, cond, uncond, t, i, params):
    """Pure-JAX reference: full 3-branch synthetic inner model + exact CFG combine."""
    w, b, wc = params
    cfg_z = jnp.concatenate([z, z, z], axis=0)
    cfg_ctx = jnp.concatenate([cond['c_crossattn'][0], uncond['c_crossattn'][0],
                               uncond['c_crossattn'][0]], axis=0)
    cfg_cc = jnp.concatenate([cond['c_concat'][0], cond['c_concat'][0],
                              uncond['c_concat'][0]], axis=0)
    x = jnp.concatenate([cfg_z, cfg_cc], axis=1).reshape(3, C_IN, HW)
    c_out = 1.0 / jnp.sqrt(sigma[0] ** 2 + 1.0)
    outs = []
    for n in range(3):
        h = w @ x[n]
        ctx_feat = wc @ jnp.mean(cfg_ctx[n], axis=0)
        outs.append(h * c_out + b + ctx_feat[:, None])
    out_cond, out_img_cond, out_uncond = outs
    res = out_uncond + t * (out_cond - out_img_cond) + i * (out_img_cond - out_uncond)
    return res.reshape(1, C_LAT, H, W_SP)


if __name__ == "__main__":
    key = jax.random.PRNGKey(0)
    ks = jax.random.split(key, 8)

    # inputs (batch 1, matching the '1 ... -> n ...' repeat in the module)
    z = jax.random.normal(ks[0], (1, C_LAT, H, W_SP), jnp.float32)
    sigma = jnp.array([1.5], jnp.float32)
    cond = {
        'c_crossattn': [jax.random.normal(ks[1], (1, SEQ, HID), jnp.float32)],
        'c_concat': [jax.random.normal(ks[2], (1, C_LAT, H, W_SP), jnp.float32)],
    }
    uncond = {
        'c_crossattn': [jax.random.normal(ks[3], (1, SEQ, HID), jnp.float32)],
        'c_concat': [jnp.zeros((1, C_LAT, H, W_SP), jnp.float32)],
    }
    text_cfg_scale = 7.5
    image_cfg_scale = 1.5

    # deterministic synthetic inner-model parameters
    w = jax.random.normal(ks[4], (C_LAT, C_IN), jnp.float32) * 0.1
    b = jax.random.normal(ks[5], (C_LAT, 1), jnp.float32) * 0.01
    wc = jax.random.normal(ks[6], (C_LAT, HID), jnp.float32) * 0.1
    params = (w, b, wc)

    # prep once (loop-invariant), then one denoising step
    prepped = prepare_cfg_conditioning(cond, uncond, text_cfg_scale, image_cfg_scale, params)
    out = cfg_denoiser_step(z, sigma, prepped)
    out = jax.block_until_ready(out)

    ref = _reference(z, sigma, cond, uncond, text_cfg_scale, image_cfg_scale, params)
    assert out.shape == (1, C_LAT, H, W_SP)
    assert jnp.allclose(out, ref, rtol=1e-4, atol=1e-4), "mismatch vs JAX reference"

    print("KERNEL_OK")
</pallas_src>

<mosaic_0001>
module attributes {stable_mosaic.version = 11 : i64} {
  func.func @_cfg_denoise_kernel(%arg0: memref<4x256xf32, #tpu.memory_space<vmem>>, %arg1: memref<4x512xf32, #tpu.memory_space<vmem>>, %arg2: memref<4x10xf32, #tpu.memory_space<vmem>>, %arg3: memref<3xf32, #tpu.memory_space<smem>>, %arg4: memref<4x256xf32, #tpu.memory_space<vmem>>) attributes {dimension_semantics = [], scalar_prefetch = 0 : i64, scratch_operands = 0 : i64, tpu.core_type = #tpu.core_type<tc>} {
    %c0 = arith.constant 0 : index
    %0 = memref.load %arg3[%c0] : memref<3xf32, #tpu.memory_space<smem>>
    %c1 = arith.constant 1 : index
    %1 = memref.load %arg3[%c1] : memref<3xf32, #tpu.memory_space<smem>>
    %c2 = arith.constant 2 : index
    %2 = memref.load %arg3[%c2] : memref<3xf32, #tpu.memory_space<smem>>
    %c0_0 = arith.constant 0 : index
    %c0_1 = arith.constant 0 : index
    %3 = vector.load %arg2[%c0_0, %c0_1] : memref<4x10xf32, #tpu.memory_space<vmem>>, vector<4x4xf32>
    %c0_2 = arith.constant 0 : index
    %c4 = arith.constant 4 : index
    %4 = vector.load %arg2[%c0_2, %c4] : memref<4x10xf32, #tpu.memory_space<vmem>>, vector<4x4xf32>
    %c0_3 = arith.constant 0 : index
    %c8 = arith.constant 8 : index
    %5 = vector.load %arg2[%c0_3, %c8] : memref<4x10xf32, #tpu.memory_space<vmem>>, vector<4x1xf32>
    %c0_4 = arith.constant 0 : index
    %c9 = arith.constant 9 : index
    %6 = vector.load %arg2[%c0_4, %c9] : memref<4x10xf32, #tpu.memory_space<vmem>>, vector<4x1xf32>
    %c0_5 = arith.constant 0 : index
    %c0_6 = arith.constant 0 : index
    %7 = vector.load %arg0[%c0_5, %c0_6] : memref<4x256xf32, #tpu.memory_space<vmem>>, vector<4x256xf32>
    %cst = arith.constant dense<0.000000e+00> : vector<4x256xf32>
    %8 = tpu.matmul %3, %7, %cst {dimension_numbers = #tpu.dot_dimension_numbers<[1], [0], [0], [1], [0, 0, 1, 1], [], []>} : vector<4x4xf32>, vector<4x256xf32>, vector<4x256xf32> -> vector<4x256xf32>
    %c0_7 = arith.constant 0 : index
    %c0_8 = arith.constant 0 : index
    %9 = vector.load %arg1[%c0_7, %c0_8] : memref<4x512xf32, #tpu.memory_space<vmem>>, vector<4x512xf32>
    %cst_9 = arith.constant dense<0.000000e+00> : vector<4x512xf32>
    %10 = tpu.matmul %4, %9, %cst_9 {dimension_numbers = #tpu.dot_dimension_numbers<[1], [0], [0], [1], [0, 0, 1, 1], [], []>} : vector<4x4xf32>, vector<4x512xf32>, vector<4x512xf32> -> vector<4x512xf32>
    %11 = vector.extract_strided_slice %10 {offsets = [0, 0], sizes = [4, 256], strides = [1, 1]} : vector<4x512xf32> to vector<4x256xf32>
    %12 = arith.addf %8, %11 : vector<4x256xf32>
    %13 = vector.broadcast %0 : f32 to vector<4x256xf32>
    %14 = arith.mulf %12, %13 : vector<4x256xf32>
    %15 = vector.extract_strided_slice %10 {offsets = [0, 256], sizes = [4, 256], strides = [1, 1]} : vector<4x512xf32> to vector<4x256xf32>
    %16 = arith.addf %8, %15 : vector<4x256xf32>
    %17 = vector.broadcast %0 : f32 to vector<4x256xf32>
    %18 = arith.mulf %16, %17 : vector<4x256xf32>
    %19 = vector.broadcast %5 : vector<4x1xf32> to vector<4x256xf32>
    %20 = arith.addf %14, %19 : vector<4x256xf32>
    %21 = vector.broadcast %6 : vector<4x1xf32> to vector<4x256xf32>
    %22 = arith.addf %14, %21 : vector<4x256xf32>
    %23 = vector.broadcast %6 : vector<4x1xf32> to vector<4x256xf32>
    %24 = arith.addf %18, %23 : vector<4x256xf32>
    %25 = arith.subf %20, %22 : vector<4x256xf32>
    %26 = vector.broadcast %1 : f32 to vector<4x256xf32>
    %27 = arith.mulf %26, %25 : vector<4x256xf32>
    %28 = arith.addf %24, %27 : vector<4x256xf32>
    %29 = arith.subf %22, %24 : vector<4x256xf32>
    %30 = vector.broadcast %2 : f32 to vector<4x256xf32>
    %31 = arith.mulf %30, %29 : vector<4x256xf32>
    %32 = arith.addf %28, %31 : vector<4x256xf32>
    %c0_10 = arith.constant 0 : index
    %c0_11 = arith.constant 0 : index
    %33 = vector.load %arg4[%c0_10, %c0_11] : memref<4x256xf32, #tpu.memory_space<vmem>>, vector<4x256xf32>
    tpu.vector_store %arg4[%c0_10, %c0_11], %32 {strides = array<i32>} : memref<4x256xf32, #tpu.memory_space<vmem>>, vector<4x256xf32>,
    return
  }
}

</mosaic_0001>

<bundles_post_ra>
// kernel: tpu_custom_call.1
= control target key start
LH: loop header
LB: loop body
LE: loop exit
PB: predicated region body
PF: predicated region fallthrough
CT: control target
= control target key end

     0   :  { %9 = vsyncpa [#allocation3], 0  ;;  %s559_s0 = inlined_call_operand.hbm [shape: f32[4,256], index: 0, kind: input, shape index: {}]   ;;  %s560_s1 = inlined_call_operand.hbm [shape: f32[4,512], index: 1, kind: input, shape index: {}]   ;;  %s561_s2 = inlined_call_operand.hbm [shape: f32[4,10], index: 2, kind: input, shape index: {}]   ;;  %s562_s3 = inlined_call_operand.vmem [shape: f32[3], index: 3, kind: input, shape index: {}]   ;;  %s563_s4 = inlined_call_operand.hbm [shape: f32[4,256], index: 4, kind: output, shape index: {}]  }
   0x1   :  { %10 = vsyncpa [#allocation7], 0 }
   0x2   :  { %11 = vsyncpa [#allocation5], 0 }
   0x3   :  { %12 = vsyncpa [#allocation4], 0  ;;  %s498_s15 = smov [#allocation6]   ;;  %s499_s17 = smov [#allocation2]  }
   0x4   :  { %s29_s16 = sshll.u32 %s498_s15, 4  ;;  %s19_s18 = sshll.u32 %s499_s17, 4  ;;  %s30_s16 = int_to_ptr.vmem [resolvable:$true] %s29_s16  ;;  %s20_s18 = int_to_ptr.vmem [resolvable:$true] %s19_s18 }
   0x5   :  { %s406_s19 = scalar_lea.vmem %s30_s16, 256  ;;  %p411_p1 = scmp.lt.s32.totalorder %s30_s16, %s30_s16 }
   0x6   :  { %p407_p0 = scmp.ne.s32.totalorder %s30_s16, %s406_s19  ;;  %p412_p2 = scmp.lt.s32.totalorder %s406_s19, %s406_s19 }
   0x8   :  { %p413_p3 = por %p412_p2, %p411_p1 }
   0xa   :  { %p414_p4 = pnand %p413_p3, %p407_p0 }
   0xc   :  { %417 = shalt.err (!%p414_p4)
}
   0xd   :  { %32 = dma.hbm_to_vmem [thread:$0]  %s560_s1, 256, %s30_s16, [#allocation7]  }
   0xe   :  { %s426_s22 = scalar_lea.vmem %s20_s18, 128  ;;  %p431_p6 = scmp.lt.s32.totalorder %s20_s18, %s20_s18 }
   0xf   :  { %p427_p5 = scmp.ne.s32.totalorder %s20_s18, %s426_s22  ;;  %p432_p7 = scmp.lt.s32.totalorder %s426_s22, %s426_s22 }
  0x11   :  { %p433_p8 = por %p432_p7, %p431_p6 }
  0x13   :  { %p434_p9 = pnand %p433_p8, %p427_p5 }
  0x15   :  { %437 = shalt.err (!%p434_p9)
}
  0x16   :  { %22 = dma.hbm_to_vmem [thread:$0]  %s559_s0, 128, %s20_s18, [#allocation3]  }
  0x17   :  { %s49_s27 = sshll.u32 %s562_s3, 4  ;;  %s500_s28 = smov [#allocation8]   ;;  %s50_s27 = int_to_ptr.vmem [resolvable:$true] %s49_s27 }
  0x18   :  { %s39_s29 = sshll.u32 %s500_s28, 4  ;;  %s40_s29 = int_to_ptr.vmem [resolvable:$true] %s39_s29 }
  0x19   :  { %s446_s1 = scalar_lea.vmem %s40_s29, 64  ;;  %p451_p11 = scmp.lt.s32.totalorder %s40_s29, %s40_s29 }
  0x1a   :  { %p447_p10 = scmp.ne.s32.totalorder %s40_s29, %s446_s1  ;;  %p452_p12 = scmp.lt.s32.totalorder %s446_s1, %s446_s1 }
  0x1c   :  { %p453_p13 = por %p452_p12, %p451_p11 }
  0x1e   :  { %p454_p0 = pnand %p453_p13, %p447_p10 }
  0x20   :  { %457 = shalt.err (!%p454_p0)
}
  0x21   :  { %42 = dma.hbm_to_vmem [thread:$0]  %s561_s2, 64, %s40_s29, [#allocation7]  }
  0x22   :  { %s458_s0 = scalar_lea.vmem %s50_s27, 16  ;;  %p463_p2 = scmp.lt.s32.totalorder %s50_s27, %s50_s27 }
  0x23   :  { %p459_p1 = scmp.ne.s32.totalorder %s50_s27, %s458_s0  ;;  %p464_p3 = scmp.lt.s32.totalorder %s458_s0, %s458_s0 }
  0x25   :  { %p465_p4 = por %p464_p3, %p463_p2 }
  0x27   :  { %p466_p5 = pnand %p465_p4, %p459_p1 }
  0x29   :  { %469 = shalt.err (!%p466_p5)
}
  0x2a   :  { %s501_s3 = smov [#allocation9]  }
  0x2b   :  { %52 = dma.vmem_to_smem %s50_s27, 16, %s501_s3, [#allocation5]  }
  0x2c   :  { %490 = dma.done.wait [#allocation3], 128  }
  0x2d   :  { %491 = vsyncadd [#allocation3], 4294967168 }
  0x2e   :  { %492 = dma.done.wait [#allocation7], 320  }
  0x2f   :  { %493 = vsyncadd [#allocation7], 4294966976 }
  0x30   :  { %494 = dma.done.wait [#allocation5], 16  }
  0x31   :  { %495 = vsyncadd [#allocation5], 4294967280 }
  0x32   :  { %65 = sfence }
  0x33   :  { %v69_v0 = vld [vmem:[#allocation8] sm:$0xf]  ;;  %v70_v1 = vld [vmem:[#allocation2] sm:$0xff]  ;;  %vm77_vm0 = vcmask 1043456   ;;  %s502_s2 = smov 124   ;;  %v503_v3 = vmov 0.0  }
  0x34   :  { %155 = vrot.lane.b32.xlu0 %v69_v0, %s502_s2  ;;  %v72_v2 = vcombine.high %v70_v1, %v70_v1  ;;  %146 = vmatprep.mubr.f32.mxu0 %v503_v3  ;;  %v154_v4 = vld [vmem:[#allocation6 + $0x8] sm:$0xff]  ;;  %v153_v5 = vld [vmem:[#allocation6] sm:$0xff]  ;;  %vm73_vm1 = vcmask 31744   ;;  %v504_v8 = vmov 9   ;;  %v505_v9 = vmov 8   ;;  %s66_s6 = sld [smem:[#allocation9]] }
  0x35   :  { %v160_v6 = vcombine.high %v154_v4, %v154_v4  ;;  %v159_v7 = vcombine.high %v153_v5, %v153_v5  ;;  %235 = vmatprep.mubr.f32.mxu1 %v503_v3  ;;  %393 = vset.pattern.permute.xlu1 %v504_v8  ;;  %s553_s7 = sld [smem:[#allocation9 + $0x1]]  ;;  %s506_s9 = smov [#allocation10]  }
  0x36   :  { %374 = vmatprep.subr.msk.mxu0 %vm77_vm0, %v72_v2  ;;  %392 = vset.pattern.permute.xlu0 %v505_v9  ;;  %s373_s8 = sld [smem:[#allocation9 + $0x2]]  ;;  %s361_s10 = sshll.u32 %s506_s9, 4  ;;  %s362_s10 = int_to_ptr.vmem [resolvable:$true] %s361_s10 }
  0x37   :  { %375 = vmatpush1.msk.msra.mxu0 %vm77_vm0, %v70_v1  ;;  %377 = vmatprep.subr.msk.mxu1 %vm77_vm0, %v159_v7  ;;  %s470_s11 = scalar_lea.vmem %s362_s10, 128  ;;  %p475_p7 = scmp.lt.s32.totalorder %s362_s10, %s362_s10 }
  0x38   :  { %376 = vmatmul.mubr.msk.f32.vlgmr.msra.gmra.mxu0 %vm73_vm1, %v69_v0  ;;  %380 = vmatprep.subr.msk.mxu0 %vm77_vm0, %v160_v6  ;;  %p471_p6 = scmp.ne.s32.totalorder %s362_s10, %s470_s11  ;;  %p476_p8 = scmp.lt.s32.totalorder %s470_s11, %s470_s11 }
  0x39   :  { %381 = vmatpush1.msk.msra.mxu0 %vm77_vm0, %v154_v4  ;;  %378 = vmatpush1.msk.msra.mxu1 %vm77_vm0, %v153_v5 }
  0x3a   :  { %306 = vmatprep.mubr.f32.mxu0 %v503_v3  ;;  %329 = vperm.xlu1 %393, %v69_v0   ;;  %v315_v15 = vstv %s66_s6  ;;  %p477_p9 = por %p476_p8, %p475_p7 }
  0x3b   :  { %323 = vperm.xlu0 %392, %v69_v0   ;;  %v338_v34 = vstv %s553_s7 }
  0x3c   :  { %v345_v40 = vstv %s373_s8  ;;  %p478_p10 = pnand %p477_p9, %p471_p6 }
  0x3f   :  { %394 = vset.pattern.permute.xlu0 %v504_v8 }
  0xa6   :  { %v156_v10 = vpop.permute.xlu0 %155 }
  0xa7   :  { %379 = vmatmul.mubr.msk.f32.vlgmr.msra.gmra.mxu1 %vm73_vm1, %v156_v10  ;;  %382 = vmatmul.mubr.msk.f32.vlgmr.msra.gmra.mxu0 %vm73_vm1, %v156_v10 }
  0xb5   :  { %v330_v18 = vpop.permute.xlu1 %329 }
  0xb6   :  { %v324_v19 = vpop.permute.xlu0 %323 }
  0xf8   :  { %v148_v11 = vpop.f32.mrf.mxu0 }
  0xfa   :  { %v150_v12 = vpop.f32.mrf.mxu0 }
 0x167   :  { %v237_v13 = vpop.f32.mrf.mxu1  ;;  %v308_v14 = vpop.f32.mrf.mxu0 }
 0x168   :  { %v313_v16 = vadd.f32 %v237_v13, %v148_v11  ;;  %v318_v17 = vadd.f32 %v308_v14, %v148_v11 }
 0x169   :  { %v239_v20 = vpop.f32.mrf.mxu1  ;;  %v310_v21 = vpop.f32.mrf.mxu0 }
 0x16a   :  { %v320_v22 = vmul.f32 %v318_v17, %v315_v15  ;;  %v314_v23 = vadd.f32 %v239_v20, %v150_v12  ;;  %v319_v24 = vadd.f32 %v310_v21, %v150_v12  ;;  %v316_v25 = vmul.f32 %v315_v15, %v313_v16 }
 0x16c   :  { %v321_v26 = vmul.f32 %v319_v24, %v315_v15  ;;  %v334_v27 = vadd.f32 %v330_v18, %v320_v22  ;;  %v317_v28 = vmul.f32 %v315_v15, %v314_v23  ;;  %v326_v29 = vadd.f32 %v324_v19, %v316_v25 }
 0x16d   :  { %v332_v30 = vadd.f32 %v330_v18, %v316_v25 }
 0x16e   :  { %v335_v31 = vadd.f32 %v330_v18, %v321_v26  ;;  %v327_v32 = vadd.f32 %v324_v19, %v317_v28  ;;  %v333_v33 = vadd.f32 %v330_v18, %v317_v28 }
 0x16f   :  { %v336_v35 = vsub.f32 %v326_v29, %v332_v30  ;;  %v343_v37 = vsub.f32 %v332_v30, %v334_v27 }
 0x170   :  { %v337_v36 = vsub.f32 %v327_v32, %v333_v33  ;;  %v344_v38 = vsub.f32 %v333_v33, %v335_v31 }
 0x171   :  { %v339_v39 = vmul.f32 %v338_v34, %v336_v35  ;;  %v346_v44 = vmul.f32 %v345_v40, %v343_v37 }
 0x172   :  { %v340_v41 = vmul.f32 %v338_v34, %v337_v36  ;;  %v347_v45 = vmul.f32 %v345_v40, %v344_v38 }
 0x173   :  { %v341_v42 = vadd.f32 %v339_v39, %v334_v27 }
 0x174   :  { %v342_v43 = vadd.f32 %v340_v41, %v335_v31 }
 0x175   :  { %v348_v46 = vadd.f32 %v346_v44, %v341_v42 }
 0x176   :  { %v349_v47 = vadd.f32 %v347_v45, %v342_v43 }
 0x178   :  { %v352_v48 = vcombine.low %v348_v46, %v349_v47 }
 0x17a   :  { %354 = vst [vmem:[#allocation10] sm:$0xff] %v352_v48 }
 0x17b   :  { %481 = shalt.err (!%p478_p10)
}
 0x17c   :  { %364 = dma.vmem_to_hbm [thread:$0]  %s362_s10, 128, %s563_s4, [#allocation4]  }
 0x17d   :  { %496 = dma.done.wait [#allocation4], 128  }
 0x17e   :  { %497 = vsyncadd [#allocation4], 4294967168 }
 0x17f   :  { %368 = vsyncpa [#allocation3], 1 }
 0x180   :  { %369 = vsyncpa [#allocation7], 1 }
 0x181   :  { %370 = vsyncpa [#allocation4], 1 }
 0x182   :  { %371 = vsyncpa [#allocation5], 1 }

</bundles_post_ra>
